<compile_context>
chip_gen: v7x
topology: tpu7x:2x2x1
jax: 0.10.0
libtpu: 0.0.40
codegen_flags: <defaults>
</compile_context>

<pallas_src>
import jax
import jax.numpy as jnp
from jax.experimental import pallas as pl
from jax.experimental.pallas import tpu as pltpu


_LANE = 128
_MXU_MIN_C = 32  # below this channel count, skip the MXU and use VPU broadcast-FMAs


def _round_up(x, m):
    return ((x + m - 1) // m) * m


def _pick_spatial_tile(S, C, *, target=1024, itemsize=4,
                       vmem_budget=12 * 1024 * 1024):
    """Largest multiple-of-128 spatial tile <= target that fits the VMEM budget."""
    ts = min(_round_up(target, _LANE), _round_up(S, _LANE))

    def vmem_bytes(t):
        # double-buffered x + out tiles, double-buffered resident weight + bias
        return 2 * 2 * C * t * itemsize + 2 * C * C * 4 + 2 * C * 4

    while ts > _LANE and vmem_bytes(ts) > vmem_budget:
        ts = max(_LANE, _round_up(ts // 2, _LANE))
    return max(ts, _LANE)


def _make_align_kernel(C, use_mxu, mxu_dtype):
    def kernel(x_ref, w_ref, b_ref, o_ref):
        # x_ref: (C_in, ts)   lanes = spatial pixels (ts is a multiple of 128)
        # w_ref: (C_out, C_in)
        # b_ref: (C_out, 1)
        x = x_ref[...]
        w = w_ref[...]
        b = b_ref[...]
        if use_mxu:
            y = jnp.dot(w.astype(mxu_dtype), x.astype(mxu_dtype),
                        preferred_element_type=jnp.float32)
        else:
            # Degenerate-matmul path: C unrolled VPU broadcast-FMAs over the
            # lane-dense spatial tile (C is a small static Python int here).
            y = w[:, 0:1] * x[0:1, :]
            for ci in range(1, C):
                y = y + w[:, ci:ci + 1] * x[ci:ci + 1, :]
        y = y + b                      # bias, f32
        z = y * y                      # square, f32
        o_ref[...] = jax.nn.sigmoid(z).astype(o_ref.dtype)   # sigmoid on EUP
    return kernel


def feature_alignment_forward(feat_student, feat_teacher, weight, bias, *,
                              spatial_tile=1024, mxu_dtype=jnp.float32):
    """feat_student / feat_teacher: (N, C, H, W) float32 (NCHW, as in PyTorch).
    weight: (C_out, C_in) 1x1-conv weight (kernel dims squeezed).
    bias:   (C_out,).
    Returns sigmoid((conv1x1(feat_student))**2), shape (N, C, H, W)."""
    del feat_teacher  # unused by the reference forward pass
    N, C, H, W = feat_student.shape
    S = H * W

    # NCHW is already (N, C, H*W) in memory: reshape is free, no transposes/pads.
    x = feat_student.reshape(N, C, S)
    w = weight.astype(jnp.float32)            # (C_out, C_in), used directly (Y = W @ X)
    b = bias.reshape(C, 1).astype(jnp.float32)

    itemsize = jnp.dtype(feat_student.dtype).itemsize
    ts = _pick_spatial_tile(S, C, target=spatial_tile, itemsize=itemsize)
    grid = (N, pl.cdiv(S, ts))                # ragged S handled by edge-masked writes
    use_mxu = C >= _MXU_MIN_C
    kernel = _make_align_kernel(C, use_mxu, mxu_dtype)

    cost = pl.CostEstimate(
        flops=int((2 * C + 3) * N * C * S),
        transcendentals=int(N * C * S),
        bytes_accessed=int(2 * N * C * S * itemsize + C * C * 4 + C * 4),
    )

    out = pl.pallas_call(
        kernel,
        out_shape=jax.ShapeDtypeStruct((N, C, S), feat_student.dtype),
        grid_spec=pltpu.PrefetchScalarGridSpec(
            num_scalar_prefetch=0,
            grid=grid,
            in_specs=[
                pl.BlockSpec((None, C, ts), lambda n, s: (n, 0, s)),  # x tile
                pl.BlockSpec((C, C), lambda n, s: (0, 0)),            # weight (resident)
                pl.BlockSpec((C, 1), lambda n, s: (0, 0)),            # bias (resident)
            ],
            out_specs=pl.BlockSpec((None, C, ts), lambda n, s: (n, 0, s)),
        ),
        compiler_params=pltpu.CompilerParams(
            dimension_semantics=("parallel", "parallel")),
        cost_estimate=cost,
    )(x, w, b)

    return out.reshape(N, C, H, W)


def init_params(key, in_channels):
    """Deterministic synthetic init for Conv2d(in_channels, in_channels, 1)."""
    kw, kb = jax.random.split(key)
    fan_in = float(in_channels)  # kernel_size=1
    bound = 1.0 / jnp.sqrt(fan_in)
    weight = jax.random.uniform(kw, (in_channels, in_channels),
                                minval=-bound, maxval=bound, dtype=jnp.float32)
    bias = jax.random.uniform(kb, (in_channels,),
                              minval=-bound, maxval=bound, dtype=jnp.float32)
    return weight, bias


def _reference(feat_student, weight, bias):
    y = jnp.einsum("nchw,oc->nohw", feat_student, weight) + bias[None, :, None, None]
    return jax.nn.sigmoid(y * y)


if __name__ == "__main__":
    key = jax.random.PRNGKey(0)
    k1, k2, k3, k4, k5 = jax.random.split(key, 5)

    # Case 1: small channel count (VPU broadcast-FMA path), module's nominal shape.
    N, C, H, W = 2, 4, 16, 16
    feat_student = jax.random.normal(k1, (N, C, H, W), dtype=jnp.float32)
    feat_teacher = jax.random.normal(k2, (N, C, H, W), dtype=jnp.float32)
    weight, bias = init_params(k3, C)

    out = feature_alignment_forward(feat_student, feat_teacher, weight, bias)
    out = jax.block_until_ready(out)
    ref = _reference(feat_student, weight, bias)
    assert out.shape == (N, C, H, W)
    assert jnp.allclose(out, ref, atol=1e-5, rtol=1e-5)

    # Case 2: larger channel count (MXU path) with a ragged spatial size
    # (exercises the edge-masked partial tile: S = 81 < ts = 128).
    N2, C2, H2, W2 = 1, 128, 9, 9
    feat_student2 = jax.random.normal(k4, (N2, C2, H2, W2), dtype=jnp.float32)
    weight2, bias2 = init_params(k5, C2)
    out2 = feature_alignment_forward(feat_student2, feat_student2, weight2, bias2)
    out2 = jax.block_until_ready(out2)
    ref2 = _reference(feat_student2, weight2, bias2)
    assert out2.shape == (N2, C2, H2, W2)
    assert jnp.allclose(out2, ref2, atol=1e-5, rtol=1e-5)

    print("KERNEL_OK")
</pallas_src>

<mosaic_0001>
module attributes {stable_mosaic.version = 11 : i64} {
  func.func @kernel(%arg0: i32, %arg1: i32, %arg2: memref<1x4x256xf32, #tpu.memory_space<vmem>>, %arg3: memref<4x4xf32, #tpu.memory_space<vmem>>, %arg4: memref<4x1xf32, #tpu.memory_space<vmem>>, %arg5: memref<1x4x256xf32, #tpu.memory_space<vmem>>) attributes {dimension_semantics = [#tpu.dimension_semantics<parallel>, #tpu.dimension_semantics<parallel>], iteration_bounds = array<i64: 2, 1>, scalar_prefetch = 0 : i64, scratch_operands = 0 : i64, tpu.core_type = #tpu.core_type<tc>, window_params = [{transform_indices = @transform_0, window_bounds = array<i64: 1, 4, 256>}, {pipeline_mode = #tpu.pipeline_mode<synchronous>, transform_indices = @transform_1, window_bounds = array<i64: 4, 4>}, {pipeline_mode = #tpu.pipeline_mode<synchronous>, transform_indices = @transform_2, window_bounds = array<i64: 4, 1>}, {transform_indices = @transform_3, window_bounds = array<i64: 1, 4, 256>}]} {
    %c0 = arith.constant 0 : index
    %c0_0 = arith.constant 0 : index
    %c0_1 = arith.constant 0 : index
    %0 = vector.load %arg2[%c0, %c0_0, %c0_1] : memref<1x4x256xf32, #tpu.memory_space<vmem>>, vector<1x4x256xf32>
    %1 = vector.shape_cast %0 : vector<1x4x256xf32> to vector<4x256xf32>
    %c0_2 = arith.constant 0 : index
    %c0_3 = arith.constant 0 : index
    %2 = vector.load %arg3[%c0_2, %c0_3] : memref<4x4xf32, #tpu.memory_space<vmem>>, vector<4x4xf32>
    %c0_4 = arith.constant 0 : index
    %c0_5 = arith.constant 0 : index
    %3 = vector.load %arg4[%c0_4, %c0_5] : memref<4x1xf32, #tpu.memory_space<vmem>>, vector<4x1xf32>
    %4 = vector.extract_strided_slice %2 {offsets = [0, 0], sizes = [4, 1], strides = [1, 1]} : vector<4x4xf32> to vector<4x1xf32>
    %5 = vector.extract_strided_slice %1 {offsets = [0, 0], sizes = [1, 256], strides = [1, 1]} : vector<4x256xf32> to vector<1x256xf32>
    %6 = vector.broadcast %4 : vector<4x1xf32> to vector<4x256xf32>
    %7 = vector.broadcast %5 : vector<1x256xf32> to vector<4x256xf32>
    %8 = arith.mulf %6, %7 : vector<4x256xf32>
    %9 = vector.extract_strided_slice %2 {offsets = [0, 1], sizes = [4, 1], strides = [1, 1]} : vector<4x4xf32> to vector<4x1xf32>
    %10 = vector.extract_strided_slice %1 {offsets = [1, 0], sizes = [1, 256], strides = [1, 1]} : vector<4x256xf32> to vector<1x256xf32>
    %11 = vector.broadcast %9 : vector<4x1xf32> to vector<4x256xf32>
    %12 = vector.broadcast %10 : vector<1x256xf32> to vector<4x256xf32>
    %13 = arith.mulf %11, %12 : vector<4x256xf32>
    %14 = arith.addf %8, %13 : vector<4x256xf32>
    %15 = vector.extract_strided_slice %2 {offsets = [0, 2], sizes = [4, 1], strides = [1, 1]} : vector<4x4xf32> to vector<4x1xf32>
    %16 = vector.extract_strided_slice %1 {offsets = [2, 0], sizes = [1, 256], strides = [1, 1]} : vector<4x256xf32> to vector<1x256xf32>
    %17 = vector.broadcast %15 : vector<4x1xf32> to vector<4x256xf32>
    %18 = vector.broadcast %16 : vector<1x256xf32> to vector<4x256xf32>
    %19 = arith.mulf %17, %18 : vector<4x256xf32>
    %20 = arith.addf %14, %19 : vector<4x256xf32>
    %21 = vector.extract_strided_slice %2 {offsets = [0, 3], sizes = [4, 1], strides = [1, 1]} : vector<4x4xf32> to vector<4x1xf32>
    %22 = vector.extract_strided_slice %1 {offsets = [3, 0], sizes = [1, 256], strides = [1, 1]} : vector<4x256xf32> to vector<1x256xf32>
    %23 = vector.broadcast %21 : vector<4x1xf32> to vector<4x256xf32>
    %24 = vector.broadcast %22 : vector<1x256xf32> to vector<4x256xf32>
    %25 = arith.mulf %23, %24 : vector<4x256xf32>
    %26 = arith.addf %20, %25 : vector<4x256xf32>
    %27 = vector.broadcast %3 : vector<4x1xf32> to vector<4x256xf32>
    %28 = arith.addf %26, %27 : vector<4x256xf32>
    %29 = arith.mulf %28, %28 : vector<4x256xf32>
    %30 = arith.negf %29 : vector<4x256xf32>
    %31 = math.exp %30 : vector<4x256xf32>
    %cst = arith.constant 1.000000e+00 : f32
    %32 = vector.broadcast %cst : f32 to vector<4x256xf32>
    %33 = arith.addf %32, %31 : vector<4x256xf32>
    %34 = arith.divf %32, %33 : vector<4x256xf32>
    %c0_6 = arith.constant 0 : index
    %c0_7 = arith.constant 0 : index
    %c0_8 = arith.constant 0 : index
    %35 = vector.load %arg5[%c0_6, %c0_7, %c0_8] : memref<1x4x256xf32, #tpu.memory_space<vmem>>, vector<1x4x256xf32>
    %36 = vector.shape_cast %35 : vector<1x4x256xf32> to vector<4x256xf32>
    %37 = vector.shape_cast %34 : vector<4x256xf32> to vector<1x4x256xf32>
    tpu.vector_store %arg5[%c0_6, %c0_7, %c0_8], %37 {strides = array<i32>} : memref<1x4x256xf32, #tpu.memory_space<vmem>>, vector<1x4x256xf32>,
    return
  }
  func.func @transform_0(%arg0: i32, %arg1: i32) -> (i32, i32, i32) {
    %c0_i32 = arith.constant 0 : i32
    %c0_i32_0 = arith.constant 0 : i32
    return %arg0, %c0_i32, %arg1 : i32, i32, i32
  }
  func.func @transform_1(%arg0: i32, %arg1: i32) -> (i32, i32) {
    %c0_i32 = arith.constant 0 : i32
    %c0_i32_0 = arith.constant 0 : i32
    %c0_i32_1 = arith.constant 0 : i32
    return %c0_i32, %c0_i32_0 : i32, i32
  }
  func.func @transform_2(%arg0: i32, %arg1: i32) -> (i32, i32) {
    %c0_i32 = arith.constant 0 : i32
    %c0_i32_0 = arith.constant 0 : i32
    %c0_i32_1 = arith.constant 0 : i32
    return %c0_i32, %c0_i32_0 : i32, i32
  }
  func.func @transform_3(%arg0: i32, %arg1: i32) -> (i32, i32, i32) {
    %c0_i32 = arith.constant 0 : i32
    %c0_i32_0 = arith.constant 0 : i32
    return %arg0, %c0_i32, %arg1 : i32, i32, i32
  }
}

</mosaic_0001>

<bundles_post_ra>
// kernel: tpu_custom_call.1
= control target key start
LH: loop header
LB: loop body
LE: loop exit
PB: predicated region body
PF: predicated region fallthrough
CT: control target
= control target key end

     0   :  { %8 = vsyncpa [#allocation3], 0  ;;  %s862_s0 = inlined_call_operand.hbm [shape: f32[2,4,256], index: 0, kind: input, shape index: {}]   ;;  %s863_s1 = inlined_call_operand.vmem [shape: f32[4,4], index: 1, kind: input, shape index: {}]   ;;  %s864_s2 = inlined_call_operand.vmem [shape: f32[4,1], index: 2, kind: input, shape index: {}]   ;;  %s865_s3 = inlined_call_operand.hbm [shape: f32[2,4,256], index: 3, kind: output, shape index: {}]  }
   0x1   :  { %10 = vsyncpa [#allocation3 + $0x1], 0 }
   0x2   :  { %11 = vsyncpa [#allocation4], 0 }
   0x3   :  { %13 = vsyncpa [#allocation4 + $0x1], 0  ;;  %s680_s12 = smov 0   ;;  %s682_s13 = smov 0  }
   0x4   :  { %s684_s14 = smov 0   ;;  %s686_s15 = smov 0  }
   0x5   :  { %s688_s16 = smov 0   ;;  %s690_s17 = smov 0  }
   0x6 LB: > { %s441_s18 = sadd.s32 4294967295, %s652_s17   ;;  %s442_s19 = sadd.s32 4294967294, %s652_s17   ;;  %s652_s17 = sphi %s690_s17, %s19_s17   ;;  %s648_s16 = sphi %s688_s16, %s881_s16   ;;  %s644_s15 = sphi %s686_s15, %s880_s15   ;;  %s640_s14 = sphi %s684_s14, %s879_s14   ;;  %s636_s13 = sphi %s682_s13, %s878_s13   ;;  %s632_s12 = sphi %s680_s12, %s877_s12  }
   0x7   : > { %s31_s20 = sadd.s32 1, %s648_s16  ;;  %s40_s21 = sadd.s32 1, %s640_s14 }
   0x8   : > { %p33_p0 = scmp.ge.s32.totalorder %s31_s20, 2  ;;  %p47_p1 = scmp.ne.s32.totalorder %s640_s14, %s636_s13 }
   0x9   : > { %p48_p2 = scmp.eq.s32.totalorder %s652_s17, 0  ;;  %p53_p3 = scmp.ne.s32.totalorder %s636_s13, %s632_s12 }
   0xa   : > { %s883_s20 = smov (%p33_p0, %s31_s20), 0  ;;  %p54_p5 = scmp.eq.s32.totalorder %s441_s18, 0 }
   0xb   : > { %p721_p4 = por %p48_p2, %p47_p1  ;;  %s35_s23 = ssub.s32 %s648_s16, %s883_s20 }
   0xc   : > { %p121_p6 = scmp.eq.s32.totalorder %s441_s18, 1  ;;  %p38_p7 = scmp.eq.s32.totalorder %s35_s23, 0 }
   0xd   : > { %p727_p8 = por %p54_p5, %p53_p3  ;;  %p127_p10 = scmp.eq.s32.totalorder %s442_s19, 1 }
   0xe   : > { %p731_p9 = por %p121_p6, %p47_p1  ;;  %p472_p13 = scmp.lt.s32.totalorder %s652_s17, 2 }
   0xf   : > { %s736_s26 = scalar_select %p38_p7, %s640_s14, %s40_s21  }
  0x10   : > { %s869_s25 = scalar_select %p731_p9, 1, 0 }
  0x11   : > { %p738_p11 = por %p127_p10, %p53_p3  ;;  %s153_s28 = sand.u32 1, %s640_s14  }
  0x12   : > { %s445_s29 = sshll.u32 %s153_s28, 3  ;;  %s458_s30 = sshll.u32 %s648_s16, 7 }
  0x13   : > { %s870_s27 = scalar_select %p738_p11, 1, 0 }
  0x14   : > { %s749_s6 = scalar_lea.hbm %s862_s0, %s458_s30  ;;  %s157_s7 = scalar_lea.vmem [#allocation2], %s445_s29 }
  0x15   : > { %s167_s8 = sshll.u32 %s157_s7, 4  ;;  %p755_p0 = pnand %p472_p13, %p721_p4  ;;  %s751_s8 = int_to_ptr.vmem [resolvable:$true] %s167_s8 }
  0x16   : > { %s154_s10 = scalar_lea.sflag [#allocation3], %s153_s28  ;;  %s540_s11 = scalar_lea.hbm %s749_s6, 128 }
  0x17   : > { %p541_p3 = scmp.ne.s32.totalorder %s749_s6, %s540_s11  ;;  %p542_p5 = pneg %p755_p0 }
  0x18   : > { %s545_s21 = scalar_lea.hbm %s862_s0, 256  ;;  %p546_p4 = scmp.lt.u32.totalorder %s749_s6, %s862_s0 }
  0x19   : > { %p543_p6 = pnand %p542_p5, %p541_p3  ;;  %p547_p10 = scmp.lt.u32.totalorder %s545_s21, %s540_s11 }
  0x1a   : > { %p549_p12 = scmp.lt.u32.totalorder %s540_s11, %s749_s6 }
  0x1b   : > { %p544_p7 = pneg %p543_p6  ;;  %p548_p13 = por %p547_p10, %p546_p4 }
  0x1d   : > { %p550_p1 = por %p549_p12, %p548_p13 }
  0x1f   : > { %p551_p2 = pnand %p550_p1, %p544_p7 }
  0x21   : > { %554 = shalt.err (!%p551_p2)
}
  0x22   : > { %s555_s28 = scalar_lea.vmem %s751_s8, 128  ;;  %s654_s29 = smov [#allocation2]  }
  0x23   : > { %p556_p3 = scmp.ne.s32.totalorder %s751_s8, %s555_s28  ;;  %s560_s30 = sshll.u32 %s654_s29, 4  ;;  %s561_s30 = int_to_ptr.vmem [resolvable:$false] %s560_s30 }
  0x24   : > { %s562_s4 = scalar_lea.vmem %s561_s30, 256  ;;  %p563_p9 = scmp.lt.s32.totalorder %s751_s8, %s561_s30 }
  0x25   : > { %p558_p6 = pnand %p556_p3, %p542_p5  ;;  %p564_p4 = scmp.lt.s32.totalorder %s562_s4, %s555_s28 }
  0x27   : > { %p559_p11 = pneg %p558_p6  ;;  %p565_p10 = por %p564_p4, %p563_p9 }
  0x29   : > { %p566_p12 = pnand %p565_p10, %p559_p11 }
  0x2b   : > { %569 = shalt.err (!%p566_p12)
}
  0x2c   : > { %467 = dma.hbm_to_vmem [thread:$0]  (!%p755_p0), %s749_s6, 128, %s751_s8, %s154_s10  }
  0x2d   : > { %p872_p1 = scmp.lt.s32.totalorder %s652_s17, 3  ;;  %p873_p2 = scmp.ge.s32.totalorder %s652_s17, 1 }
  0x2f   : > { %p173_p5 = pnand %p873_p2, %p872_p1 }
  0x30   : > { %s791_s5 = sand.u32 (!%p173_p5), 1, %s636_s13  }
  0x31   : > { %176 = sbr.rel (%p173_p5) target bundleno = 247 (0xf7), region = 32  ;;  %s449_s7 = sshll.u32 (!%p173_p5), %s791_s5, 3 }
  0x32   : > { %s179_s11 = scalar_lea.sflag (!%p173_p5), [#allocation3], %s791_s5  ;;  %s182_s9 = scalar_lea.vmem (!%p173_p5), [#allocation2], %s449_s7 }
  0x38   : > { %623 = dma.done.wait (%p727_p8), %s179_s11, 128  }
  0x39   : > { %625 = vsyncadd (%p727_p8), %s179_s11, 4294967168  ;;  %v655_v0 = vmov 0   ;;  %v656_v1 = vmov 2   ;;  %v208_v2 = vld [vmem:[%s863_s1] sm:$0xf]  ;;  %v657_v3 = vmov 1   ;;  %v216_v6 = vlaneseq }
  0x3a   : > { %526 = vset.pattern.permute.xlu0 %v655_v0  ;;  %528 = vset.pattern.permute.xlu1 %v656_v1  ;;  %v658_v4 = vmov 3   ;;  %v209_v5 = vld [vmem:[%s864_s2] sm:$0xf]  ;;  %s459_s24 = sshll.u32 %s644_s15, 7  ;;  %s204_s19 = scalar_lea.vmem [#allocation5], %s449_s7 }
  0x3b   : > { %212 = vperm.xlu0 %526, %v208_v2   ;;  %263 = vperm.xlu1 %528, %v208_v2   ;;  %v217_v7 = vshrl.u32 %v216_v6, 7  ;;  %v207_v12 = vld [vmem:[%s182_s9] sm:$0xff]  ;;  %s357_s21 = sshll.u32 %s204_s19, 4  ;;  %s813_s28 = scalar_lea.hbm %s865_s3, %s459_s24  ;;  %s815_s21 = int_to_ptr.vmem [resolvable:$true] %s357_s21 }
  0x3c   : > { %s341_s29 = scalar_lea.sflag [#allocation4], %s791_s5  ;;  %s570_s30 = scalar_lea.vmem %s815_s21, 128 }
  0x3d   : > { %v218_v8 = vsub.s32 0, %v217_v7  ;;  %v222_v9 = vsub.s32 4, %v217_v7  ;;  %v242_v10 = vsub.s32 1, %v217_v7  ;;  %v246_v11 = vsub.s32 5, %v217_v7  ;;  %p571_p8 = scmp.ne.s32.totalorder %s815_s21, %s570_s30  ;;  %p874_p9 = scmp.ne.s32.totalorder %s869_s25, 0 }
  0x3e   : > { %v268_v13 = vsub.s32 2, %v217_v7  ;;  %v272_v14 = vsub.s32 6, %v217_v7  ;;  %v294_v15 = vsub.s32 3, %v217_v7  ;;  %v298_v16 = vsub.s32 7, %v217_v7  ;;  %s659_s15 = smov [#allocation5]  }
  0x3f   : > { %527 = vset.pattern.permute.xlu0 %v657_v3  ;;  %529 = vset.pattern.permute.xlu1 %v658_v4  ;;  %v219_v17 = vrot.slane %v207_v12, %v218_v8  ;;  %v223_v18 = vrot.slane %v207_v12, %v222_v9  ;;  %v243_v19 = vrot.slane %v207_v12, %v242_v10  ;;  %p572_p11 = pnand %p571_p8, %p874_p9  ;;  %s574_s4 = sshll.u32 %s659_s15, 4  ;;  %s575_s4 = int_to_ptr.vmem [resolvable:$false] %s574_s4 }
  0x40   : > { %237 = vperm.xlu0 %527, %v208_v2   ;;  %289 = vperm.xlu1 %529, %v208_v2   ;;  %v247_v20 = vrot.slane %v207_v12, %v246_v11  ;;  %v269_v21 = vrot.slane %v207_v12, %v268_v13  ;;  %v273_v22 = vrot.slane %v207_v12, %v272_v14  ;;  %s576_s7 = scalar_lea.vmem %s575_s4, 256  ;;  %p577_p7 = scmp.lt.s32.totalorder %s815_s21, %s575_s4 }
  0x41   : > { %v295_v25 = vrot.slane %v207_v12, %v294_v15  ;;  %v299_v26 = vrot.slane %v207_v12, %v298_v16  ;;  %v229_v27 = vrot.slane %v219_v17, %v218_v8  ;;  %v233_v28 = vrot.slane %v223_v18, %v218_v8  ;;  %p573_p0 = pneg %p572_p11  ;;  %p578_p13 = scmp.lt.s32.totalorder %s576_s7, %s570_s30 }
  0x42   : > { %v253_v29 = vrot.slane %v243_v19, %v242_v10  ;;  %v257_v30 = vrot.slane %v247_v20, %v242_v10  ;;  %v279_v31 = vrot.slane %v269_v21, %v268_v13  ;;  %v283_v32 = vrot.slane %v273_v22, %v268_v13 }
  0x43   : > { %v305_v33 = vrot.slane %v295_v25, %v294_v15  ;;  %v309_v34 = vrot.slane %v299_v26, %v294_v15  ;;  %p579_p3 = por %p578_p13, %p577_p7 }
  0x44   : > { %530 = vset.pattern.permute.xlu1 %v655_v0  ;;  %531 = vset.pattern.permute.xlu0 %v655_v0 }
  0x45   : > { %316 = vperm.xlu1 %530, %v209_v5   ;;  %p580_p6 = pnand %p579_p3, %p573_p0 }
  0xba   : > { %v213_v23 = vpop.permute.xlu0 %212  ;;  %v264_v24 = vpop.permute.xlu1 %263 }
  0xbb   : > { %v234_v37 = vmul.f32 %v229_v27, %v213_v23  ;;  %v235_v38 = vmul.f32 %v233_v28, %v213_v23  ;;  %v284_v41 = vmul.f32 %v279_v31, %v264_v24  ;;  %v285_v42 = vmul.f32 %v283_v32, %v264_v24 }
  0xbf   : > { %v238_v35 = vpop.permute.xlu0 %237  ;;  %v290_v36 = vpop.permute.xlu1 %289 }
  0xc0   : > { %v258_v39 = vmul.f32 %v253_v29, %v238_v35  ;;  %v259_v40 = vmul.f32 %v257_v30, %v238_v35  ;;  %v310_v45 = vmul.f32 %v305_v33, %v290_v36  ;;  %v311_v46 = vmul.f32 %v309_v34, %v290_v36 }
  0xc2   : > { %v260_v43 = vadd.f32 %v258_v39, %v234_v37  ;;  %v261_v44 = vadd.f32 %v259_v40, %v235_v38 }
  0xc4   : > { %v286_v47 = vadd.f32 %v284_v41, %v260_v43  ;;  %v287_v48 = vadd.f32 %v285_v42, %v261_v44  ;;  %v317_v49 = vpop.permute.xlu1 %316 }
  0xc6   : > { %v312_v50 = vadd.f32 %v310_v45, %v286_v47  ;;  %v313_v51 = vadd.f32 %v311_v46, %v287_v48 }
  0xc8   : > { %v319_v52 = vadd.f32 %v317_v49, %v312_v50  ;;  %v320_v53 = vadd.f32 %v317_v49, %v313_v51 }
  0xca   : > { %v321_v54 = vmul.f32 %v319_v52, %v319_v52  ;;  %v322_v55 = vmul.f32 %v320_v53, %v320_v53 }
  0xcc   : > { %v451_v56 = vmul.f32 -1.442695, %v321_v54  ;;  %v452_v57 = vmul.f32 -1.442695, %v322_v55 }
  0xce   : > { %532 = vpow2.f32 %v451_v56 }
  0xcf   : > { %534 = vpow2.f32 %v452_v57 }
  0xd8   : > { %v533_v58 = vpop.eup %532 }
  0xd9   : > { %v535_v59 = vpop.eup %534  ;;  %v329_v60 = vadd.f32 1.0, %v533_v58 }
  0xda   : > { %v330_v61 = vadd.f32 1.0, %v535_v59 }
  0xdb   : > { %536 = vrcp.f32 %v329_v60 }
  0xdc   : > { %538 = vrcp.f32 %v330_v61 }
  0xe5   : > { %v537_v62 = vpop.eup %536 }
  0xe6   : > { %v539_v63 = vpop.eup %538 }
  0xe7   : > { %v337_v0 = vcombine.low %v537_v62, %v539_v63 }
  0xe9   : > { %339 = vst [vmem:[%s204_s19] sm:$0xff] %v337_v0 }
  0xea   : > { %583 = shalt.err (!%p580_p6)
}
  0xeb   : > { %s584_s5 = scalar_lea.hbm %s813_s28, 128  ;;  %s588_s6 = scalar_lea.hbm %s865_s3, 256 }
  0xec   : > { %p585_p4 = scmp.ne.s32.totalorder %s813_s28, %s584_s5  ;;  %p589_p1 = scmp.lt.u32.totalorder %s813_s28, %s865_s3 }
  0xed   : > { %p590_p2 = scmp.lt.u32.totalorder %s588_s6, %s584_s5  ;;  %p592_p8 = scmp.lt.u32.totalorder %s584_s5, %s813_s28 }
  0xee   : > { %p586_p10 = pnand %p585_p4, %p874_p9 }
  0xef   : > { %p591_p5 = por %p590_p2, %p589_p1 }
  0xf0   : > { %p587_p12 = pneg %p586_p10 }
  0xf1   : > { %p593_p11 = por %p592_p8, %p591_p5 }
  0xf3   : > { %p594_p0 = pnand %p593_p11, %p587_p12 }
  0xf5   : > { %597 = shalt.err (!%p594_p0)
}
  0xf6   : > { %462 = dma.vmem_to_hbm [thread:$0]  (%p874_p9), %s815_s21, 128, %s813_s28, %s341_s29  }
  0xf7 PF: > { %s369_s18 = sand.u32 1, %s632_s12   ;;  %p875_p7 = scmp.ne.s32.totalorder %s870_s27, 0 }
  0xf8   : > { %p876_p13 = scmp.ge.s32.totalorder %s652_s17, 2  ;;  %s370_s24 = scalar_lea.sflag [#allocation4], %s369_s18 }
  0xfa   : > { %p469_p3 = pnand %p876_p13, %p875_p7 }
  0xfc   : > { %627 = dma.done.wait (!%p469_p3), %s370_s24, 128  }
  0xfd   : > { %629 = vsyncadd (!%p469_p3), %s370_s24, 4294967168  ;;  %s19_s17 = sadd.s32 1, %s652_s17   ;;  %s877_s12 = smov %s636_s13 }
  0xfe   : > { %p16_p6 = scmp.ge.s32.totalorder %s19_s17, 4   ;;  %s878_s13 = smov %s640_s14 }
  0xff   : > { %s879_s14 = smov %s736_s26  ;;  %s880_s15 = smov %s648_s16 }
 0x100   : > { %s881_s16 = smov %s883_s20  ;;  %18 = sbr.rel (!%p16_p6) target bundleno = 6 (0x6), region = 77 }
 0x107   :  { %375 = vsyncpa [#allocation3], 1 }
 0x108   :  { %377 = vsyncpa [#allocation3 + $0x1], 1 }
 0x109   :  { %378 = vsyncpa [#allocation4], 1 }
 0x10a   :  { %380 = vsyncpa [#allocation4 + $0x1], 1 }

</bundles_post_ra>
